<compile_context>
chip_gen: v6e
topology: v6e:2x2x1
jax: 0.10.0
libtpu: 0.0.40
codegen_flags: <defaults>
</compile_context>

<pallas_src>
import jax
import jax.numpy as jnp
from jax.experimental import pallas as pl
from jax.experimental.pallas import tpu as pltpu


# ---------------------------------------------------------------------------
# Fused kernel: bn1(scale/bias) -> bf16 matmul (MXU) -> +fc_bias -> bn2
# ---------------------------------------------------------------------------
def _fc_emom_kernel(x_ref, s1_ref, b1_ref, w_ref, bfc_ref, s2_ref, b2_ref,
                    nobn_ref, feat_ref):
    # bn1 folded per-element scale/bias on the flattened activations (f32, VPU).
    xb = x_ref[...] * s1_ref[...] + b1_ref[...]
    # fc matmul: bf16 x bf16 inputs, f32 accumulation on the MXU.
    acc = jnp.dot(xb.astype(jnp.bfloat16), w_ref[...],
                  preferred_element_type=jnp.float32)
    y = acc + bfc_ref[...]                      # fc bias, f32 epilogue
    nobn_ref[...] = y.astype(nobn_ref.dtype)    # feature_nobn
    # bn2 (affine=False, inference) folded into per-feature scale/bias.
    feat_ref[...] = (y * s2_ref[...] + b2_ref[...]).astype(feat_ref.dtype)


def fc_emom_forward(x_nchw, p, *, tile_n=128):
    """Full get_fc_EMom forward. x_nchw: (N, C, H, W) f32."""
    N, C, H, W = x_nchw.shape
    K = C * H * W
    Kw, F = p["fc_w_t"].shape
    assert Kw == K, (Kw, K)
    if F % tile_n != 0:
        tile_n = F  # tiny-model fallback; F is expected to be a 128-multiple
    grid = (F // tile_n,)

    # Flatten exactly like PyTorch's x.view(N, -1) (channel-major).
    x2d = x_nchw.reshape(N, K).astype(jnp.float32)
    # Broadcast per-channel bn1 scale/bias over the flattened C*H*W axis.
    s1 = jnp.repeat(p["bn1_scale"], H * W)[None, :]          # (1, K)
    b1 = jnp.repeat(p["bn1_bias"], H * W)[None, :]           # (1, K)
    w_bf16 = p["fc_w_t"].astype(jnp.bfloat16)                # (K, F)
    bfc = p["fc_b"][None, :]                                 # (1, F)
    s2 = p["bn2_scale"][None, :]                             # (1, F)
    b2 = p["bn2_bias"][None, :]                              # (1, F)

    nobn, feat_full = pl.pallas_call(
        _fc_emom_kernel,
        out_shape=(jax.ShapeDtypeStruct((N, F), jnp.float32),
                   jax.ShapeDtypeStruct((N, F), jnp.float32)),
        grid_spec=pltpu.PrefetchScalarGridSpec(
            num_scalar_prefetch=0,
            grid=grid,
            in_specs=[
                pl.BlockSpec((N, K), lambda j: (0, 0)),       # activations (full)
                pl.BlockSpec((1, K), lambda j: (0, 0)),       # bn1 scale
                pl.BlockSpec((1, K), lambda j: (0, 0)),       # bn1 bias
                pl.BlockSpec((K, tile_n), lambda j: (0, j)),  # fc weight slab
                pl.BlockSpec((1, tile_n), lambda j: (0, j)),  # fc bias
                pl.BlockSpec((1, tile_n), lambda j: (0, j)),  # bn2 scale
                pl.BlockSpec((1, tile_n), lambda j: (0, j)),  # bn2 bias
            ],
            out_specs=[
                pl.BlockSpec((N, tile_n), lambda j: (0, j)),  # feature_nobn
                pl.BlockSpec((N, tile_n), lambda j: (0, j)),  # bn2(feature)
            ],
        ),
        compiler_params=pltpu.CompilerParams(
            dimension_semantics=("parallel",),
        ),
    )(x2d, s1, b1, w_bf16, bfc, s2, b2)

    # PyTorch: output['feature'] = bn2(cat(x, x))[:1, :]
    return {"feature_nobn": nobn, "feature": feat_full[:1, :]}


# ---------------------------------------------------------------------------
# Deterministic synthetic parameters matching the module's shapes
# ---------------------------------------------------------------------------
def init_params(key, *, in_feature, in_h, in_w, out_feature):
    keys = iter(jax.random.split(key, 8))
    K = in_feature * in_h * in_w
    eps1, eps2 = 1e-5, 2e-5

    # bn1 = BatchNorm2d(in_feature, affine=True), folded (inference).
    gamma = 1.0 + 0.1 * jax.random.normal(next(keys), (in_feature,), jnp.float32)
    beta = 0.1 * jax.random.normal(next(keys), (in_feature,), jnp.float32)
    rmean1 = 0.1 * jax.random.normal(next(keys), (in_feature,), jnp.float32)
    rvar1 = jnp.abs(1.0 + 0.1 * jax.random.normal(next(keys), (in_feature,),
                                                  jnp.float32))
    inv1 = gamma * jax.lax.rsqrt(rvar1 + eps1)
    bn1_scale = inv1
    bn1_bias = beta - rmean1 * inv1

    # fc = Linear(K, out_feature); stored transposed (K, out) for the matmul.
    fc_w_t = (jax.random.normal(next(keys), (K, out_feature), jnp.float32)
              / jnp.sqrt(jnp.float32(K)))
    fc_b = 0.01 * jax.random.normal(next(keys), (out_feature,), jnp.float32)

    # bn2 = BatchNorm1d(out_feature, affine=False, eps=2e-5), folded (inference).
    rmean2 = 0.1 * jax.random.normal(next(keys), (out_feature,), jnp.float32)
    rvar2 = jnp.abs(1.0 + 0.1 * jax.random.normal(next(keys), (out_feature,),
                                                  jnp.float32))
    bn2_scale = jax.lax.rsqrt(rvar2 + eps2)
    bn2_bias = -rmean2 * bn2_scale

    return {
        "bn1_scale": bn1_scale, "bn1_bias": bn1_bias,
        "fc_w_t": fc_w_t, "fc_b": fc_b,
        "bn2_scale": bn2_scale, "bn2_bias": bn2_bias,
    }


if __name__ == "__main__":
    key = jax.random.PRNGKey(0)
    k_x, k_p = jax.random.split(key)

    # get_fc_EMom(in_feature=32, in_h=8, in_w=8, out_feature=256); x is NCHW.
    N, C, H, W, F = 2, 32, 8, 8, 256
    x = jax.random.normal(k_x, (N, C, H, W), jnp.float32)
    params = init_params(k_p, in_feature=C, in_h=H, in_w=W, out_feature=F)

    out = fc_emom_forward(x, params)
    out = jax.block_until_ready(out)
    assert out["feature_nobn"].shape == (N, F), out["feature_nobn"].shape
    assert out["feature"].shape == (1, F), out["feature"].shape
    assert out["feature_nobn"].dtype == jnp.float32
    assert out["feature"].dtype == jnp.float32
    print("KERNEL_OK")
</pallas_src>

<mosaic_0001>
module attributes {stable_mosaic.version = 11 : i64} {
  func.func @_fc_emom_kernel(%arg0: i32, %arg1: memref<2x2048xf32, #tpu.memory_space<vmem>>, %arg2: memref<1x2048xf32, #tpu.memory_space<vmem>>, %arg3: memref<1x2048xf32, #tpu.memory_space<vmem>>, %arg4: memref<2048x128xbf16, #tpu.memory_space<vmem>>, %arg5: memref<1x128xf32, #tpu.memory_space<vmem>>, %arg6: memref<1x128xf32, #tpu.memory_space<vmem>>, %arg7: memref<1x128xf32, #tpu.memory_space<vmem>>, %arg8: memref<2x128xf32, #tpu.memory_space<vmem>>, %arg9: memref<2x128xf32, #tpu.memory_space<vmem>>) attributes {dimension_semantics = [#tpu.dimension_semantics<parallel>], iteration_bounds = array<i64: 2>, scalar_prefetch = 0 : i64, scratch_operands = 0 : i64, tpu.core_type = #tpu.core_type<tc>, window_params = [{pipeline_mode = #tpu.pipeline_mode<synchronous>, transform_indices = @transform_0, window_bounds = array<i64: 2, 2048>}, {pipeline_mode = #tpu.pipeline_mode<synchronous>, transform_indices = @transform_1, window_bounds = array<i64: 1, 2048>}, {pipeline_mode = #tpu.pipeline_mode<synchronous>, transform_indices = @transform_2, window_bounds = array<i64: 1, 2048>}, {transform_indices = @transform_3, window_bounds = array<i64: 2048, 128>}, {transform_indices = @transform_4, window_bounds = array<i64: 1, 128>}, {transform_indices = @transform_5, window_bounds = array<i64: 1, 128>}, {transform_indices = @transform_6, window_bounds = array<i64: 1, 128>}, {transform_indices = @transform_7, window_bounds = array<i64: 2, 128>}, {transform_indices = @transform_8, window_bounds = array<i64: 2, 128>}]} {
    %c0 = arith.constant 0 : index
    %c0_0 = arith.constant 0 : index
    %0 = vector.load %arg1[%c0, %c0_0] : memref<2x2048xf32, #tpu.memory_space<vmem>>, vector<2x2048xf32>
    %c0_1 = arith.constant 0 : index
    %c0_2 = arith.constant 0 : index
    %1 = vector.load %arg2[%c0_1, %c0_2] : memref<1x2048xf32, #tpu.memory_space<vmem>>, vector<1x2048xf32>
    %2 = vector.broadcast %1 : vector<1x2048xf32> to vector<2x2048xf32>
    %3 = arith.mulf %0, %2 : vector<2x2048xf32>
    %c0_3 = arith.constant 0 : index
    %c0_4 = arith.constant 0 : index
    %4 = vector.load %arg3[%c0_3, %c0_4] : memref<1x2048xf32, #tpu.memory_space<vmem>>, vector<1x2048xf32>
    %5 = vector.broadcast %4 : vector<1x2048xf32> to vector<2x2048xf32>
    %6 = arith.addf %3, %5 : vector<2x2048xf32>
    %7 = arith.truncf %6 : vector<2x2048xf32> to vector<2x2048xbf16>
    %c0_5 = arith.constant 0 : index
    %c0_6 = arith.constant 0 : index
    %8 = vector.load %arg4[%c0_5, %c0_6] : memref<2048x128xbf16, #tpu.memory_space<vmem>>, vector<2048x128xbf16>
    %cst = arith.constant dense<0.000000e+00> : vector<2x128xf32>
    %9 = tpu.matmul %7, %8, %cst {dimension_numbers = #tpu.dot_dimension_numbers<[1], [0], [0], [1], [0, 0, 1, 1], [], []>} : vector<2x2048xbf16>, vector<2048x128xbf16>, vector<2x128xf32> -> vector<2x128xf32>
    %c0_7 = arith.constant 0 : index
    %c0_8 = arith.constant 0 : index
    %10 = vector.load %arg5[%c0_7, %c0_8] : memref<1x128xf32, #tpu.memory_space<vmem>>, vector<1x128xf32>
    %11 = vector.broadcast %10 : vector<1x128xf32> to vector<2x128xf32>
    %12 = arith.addf %9, %11 : vector<2x128xf32>
    %c0_9 = arith.constant 0 : index
    %c0_10 = arith.constant 0 : index
    %13 = vector.load %arg8[%c0_9, %c0_10] : memref<2x128xf32, #tpu.memory_space<vmem>>, vector<2x128xf32>
    tpu.vector_store %arg8[%c0_9, %c0_10], %12 {strides = array<i32>} : memref<2x128xf32, #tpu.memory_space<vmem>>, vector<2x128xf32>,
    %c0_11 = arith.constant 0 : index
    %c0_12 = arith.constant 0 : index
    %14 = vector.load %arg6[%c0_11, %c0_12] : memref<1x128xf32, #tpu.memory_space<vmem>>, vector<1x128xf32>
    %15 = vector.broadcast %14 : vector<1x128xf32> to vector<2x128xf32>
    %16 = arith.mulf %12, %15 : vector<2x128xf32>
    %c0_13 = arith.constant 0 : index
    %c0_14 = arith.constant 0 : index
    %17 = vector.load %arg7[%c0_13, %c0_14] : memref<1x128xf32, #tpu.memory_space<vmem>>, vector<1x128xf32>
    %18 = vector.broadcast %17 : vector<1x128xf32> to vector<2x128xf32>
    %19 = arith.addf %16, %18 : vector<2x128xf32>
    %c0_15 = arith.constant 0 : index
    %c0_16 = arith.constant 0 : index
    %20 = vector.load %arg9[%c0_15, %c0_16] : memref<2x128xf32, #tpu.memory_space<vmem>>, vector<2x128xf32>
    tpu.vector_store %arg9[%c0_15, %c0_16], %19 {strides = array<i32>} : memref<2x128xf32, #tpu.memory_space<vmem>>, vector<2x128xf32>,
    return
  }
  func.func @transform_0(%arg0: i32) -> (i32, i32) {
    %c0_i32 = arith.constant 0 : i32
    %c0_i32_0 = arith.constant 0 : i32
    %c0_i32_1 = arith.constant 0 : i32
    return %c0_i32, %c0_i32_0 : i32, i32
  }
  func.func @transform_1(%arg0: i32) -> (i32, i32) {
    %c0_i32 = arith.constant 0 : i32
    %c0_i32_0 = arith.constant 0 : i32
    %c0_i32_1 = arith.constant 0 : i32
    return %c0_i32, %c0_i32_0 : i32, i32
  }
  func.func @transform_2(%arg0: i32) -> (i32, i32) {
    %c0_i32 = arith.constant 0 : i32
    %c0_i32_0 = arith.constant 0 : i32
    %c0_i32_1 = arith.constant 0 : i32
    return %c0_i32, %c0_i32_0 : i32, i32
  }
  func.func @transform_3(%arg0: i32) -> (i32, i32) {
    %c0_i32 = arith.constant 0 : i32
    %c0_i32_0 = arith.constant 0 : i32
    return %c0_i32, %arg0 : i32, i32
  }
  func.func @transform_4(%arg0: i32) -> (i32, i32) {
    %c0_i32 = arith.constant 0 : i32
    %c0_i32_0 = arith.constant 0 : i32
    return %c0_i32, %arg0 : i32, i32
  }
  func.func @transform_5(%arg0: i32) -> (i32, i32) {
    %c0_i32 = arith.constant 0 : i32
    %c0_i32_0 = arith.constant 0 : i32
    return %c0_i32, %arg0 : i32, i32
  }
  func.func @transform_6(%arg0: i32) -> (i32, i32) {
    %c0_i32 = arith.constant 0 : i32
    %c0_i32_0 = arith.constant 0 : i32
    return %c0_i32, %arg0 : i32, i32
  }
  func.func @transform_7(%arg0: i32) -> (i32, i32) {
    %c0_i32 = arith.constant 0 : i32
    %c0_i32_0 = arith.constant 0 : i32
    return %c0_i32, %arg0 : i32, i32
  }
  func.func @transform_8(%arg0: i32) -> (i32, i32) {
    %c0_i32 = arith.constant 0 : i32
    %c0_i32_0 = arith.constant 0 : i32
    return %c0_i32, %arg0 : i32, i32
  }
}

</mosaic_0001>

<bundles_post_ra>
// kernel: tpu_custom_call.1
= control target key start
LH: loop header
LB: loop body
LE: loop exit
PB: predicated region body
PF: predicated region fallthrough
CT: control target
= control target key end

     0   :  { %s3668_s0 = inlined_call_operand.hbm [shape: f32[2,2048], index: 0, kind: input, shape index: {}]   ;;  %s3669_s1 = inlined_call_operand.hbm [shape: f32[1,2048], index: 1, kind: input, shape index: {}]   ;;  %s3670_s2 = inlined_call_operand.hbm [shape: f32[1,2048], index: 2, kind: input, shape index: {}]   ;;  %s3671_s3 = inlined_call_operand.hbm [shape: bf16[2048,256], index: 3, kind: input, shape index: {}]   ;;  %s3672_s4 = inlined_call_operand.vmem [shape: f32[1,256], index: 4, kind: input, shape index: {}]   ;;  %s3673_s5 = inlined_call_operand.vmem [shape: f32[1,256], index: 5, kind: input, shape index: {}]   ;;  %s3674_s6 = inlined_call_operand.vmem [shape: f32[1,256], index: 6, kind: input, shape index: {}]   ;;  %s3675_s7 = inlined_call_operand.hbm [shape: f32[2,256], index: 7, kind: output, shape index: {0}]   ;;  %s3676_s8 = inlined_call_operand.hbm [shape: f32[2,256], index: 8, kind: output, shape index: {1}]  }
   0x1   :  { %3682 = sst [smem:[#allocation18_spill]] %s3668_s0 }
   0x2   :  { %3683 = sst [smem:[#allocation19_spill]] %s3669_s1 }
   0x3   :  { %14 = vsyncpa [#allocation3], 0 }
   0x4   :  { %15 = vsyncpa [#allocation6], 0 }
   0x5   :  { %16 = vsyncpa [#allocation9], 0 }
   0x6   :  { %18 = vsyncpa [#allocation9 + $0x1], 0 }
   0x7   :  { %19 = vsyncpa [#allocation4], 0 }
   0x8   :  { %21 = vsyncpa [#allocation4 + $0x1], 0 }
   0x9   :  { %22 = vsyncpa [#allocation12], 0 }
   0xa   :  { %24 = vsyncpa [#allocation12 + $0x1], 0  ;;  %s3179_s27 = smov 0   ;;  %s3181_s28 = smov 0  }
   0xb   :  { %s3183_s29 = smov 0   ;;  %s3185_s30 = smov 0  }
   0xc LB: > { %s3200_s9 = sadd.s32 4294967295, %s3122_s30   ;;  %s2372_s10 = sadd.s32 4294967294, %s3122_s30   ;;  %s3122_s30 = sphi %s3185_s30, %s3708_s30   ;;  %s3118_s29 = sphi %s3183_s29, %s3707_s29   ;;  %s3114_s28 = sphi %s3181_s28, %s3706_s28   ;;  %s3110_s27 = sphi %s3179_s27, %s3705_s27  }
   0xd   : > { %s3204_s11 = sadd.s32 1, %s3122_s30   ;;  %s100_s12 = sadd.s32 1, %s3118_s29 }
   0xe   : > { %s97_s13 = ssub.s32 %s3122_s30, %s3204_s11  ;;  %p107_p0 = scmp.ne.s32.totalorder %s3118_s29, %s3114_s28 }
   0xf   : > { %p98_p1 = scmp.eq.s32.totalorder %s97_s13, 0  ;;  %p108_p2 = scmp.eq.s32.totalorder %s3122_s30, 0 }
  0x10   : > { %p113_p3 = scmp.ne.s32.totalorder %s3114_s28, %s3110_s27  ;;  %p3677_p4 = scmp.eq.s32.totalorder %s3200_s9, 0 }
  0x11   : > { %s3216_s14 = scalar_select %p98_p1, %s3118_s29, %s100_s12  }
  0x12   : > { %p3218_p5 = por %p108_p2, %p107_p0  ;;  %p3224_p6 = por %p3677_p4, %p113_p3 }
  0x13   : > { %p215_p7 = scmp.eq.s32.totalorder %s3200_s9, 1  ;;  %p221_p8 = scmp.eq.s32.totalorder %s2372_s10, 1 }
  0x14   : > { %s3685_s16 = scalar_select %p3224_p6, 1, 0 }
  0x15   : > { %p2373_p9 = scmp.ge.s32.totalorder %s3122_s30, 1  ;;  %p254_p10 = scmp.lt.s32.totalorder %s3122_s30, 3 }
  0x16   : > { %p3231_p11 = por %p215_p7, %p107_p0  ;;  %p3235_p12 = por %p221_p8, %p113_p3 }
  0x17   : > { %p3239_p13 = pnand %p2373_p9, %p254_p10  ;;  %s3124_s20 = smov [#allocation5]  }
  0x18   : > { %s3686_s17 = scalar_select %p3231_p11, 1, 0 }
  0x19   : > { %s3687_s18 = scalar_select %p3235_p12, 1, 0 }
  0x1a   : > { %s3688_s19 = scalar_select %p3239_p13, 1, 0 }
  0x1b   : > { %p2718_p2 = pneg %p3239_p13  ;;  %s278_s21 = sshll.u32 %s3124_s20, 4  ;;  %s279_s21 = int_to_ptr.vmem [resolvable:$true] %s278_s21 }
  0x1c   : > { %p2742_p4 = scmp.lt.s32.totalorder %s3122_s30, 2  ;;  %p3689_p0 = scmp.eq.s32.totalorder %s3200_s9, 0 }
  0x1d   : > { %s3125_s24 = smov [#allocation2]   ;;  %s2925_s26 = scalar_lea.vmem %s279_s21, 256 }
  0x1e   : > { %p3249_p7 = pnand %p2718_p2, %p3689_p0  ;;  %p3255_p3 = pnand %p2742_p4, %p3218_p5 }
  0x1f   : > { %s267_s25 = sshll.u32 %s3125_s24, 4  ;;  %p2926_p9 = scmp.ne.s32.totalorder %s279_s21, %s2925_s26  ;;  %s268_s25 = int_to_ptr.vmem [resolvable:$true] %s267_s25 }
  0x20   : > { %s3691_s23 = scalar_select %p3255_p3, 1, 0 }
  0x21   : > { %p2916_p8 = pneg %p3249_p7  ;;  %p2933_p0 = scmp.lt.s32.totalorder %s279_s21, %s279_s21 }
  0x22   : > { %p2934_p1 = scmp.lt.s32.totalorder %s2925_s26, %s2925_s26 }
  0x23   : > { %p2928_p10 = pnand %p2926_p9, %p2916_p8 }
  0x24   : > { %p2935_p12 = por %p2934_p1, %p2933_p0 }
  0x25   : > { %p2929_p2 = pneg %p2928_p10 }
  0x27   : > { %p2936_p11 = pnand %p2935_p12, %p2929_p2 }
  0x29   : > { %2939 = shalt.err (!%p2936_p11)
}
  0x2a   : > { %s3692_s1 = sld [smem:[#allocation19_spill]]  ;;  %s2951_s13 = scalar_lea.vmem %s268_s25, 512 }
  0x2b   : > { %p2952_p4 = scmp.ne.s32.totalorder %s268_s25, %s2951_s13  ;;  %p2959_p9 = scmp.lt.s32.totalorder %s268_s25, %s268_s25 }
  0x2c   : > { %p2960_p10 = scmp.lt.s32.totalorder %s2951_s13, %s2951_s13 }
  0x2d   : > { %p2954_p5 = pnand %p2952_p4, %p2916_p8 }
  0x2e   : > { %p2961_p13 = por %p2960_p10, %p2959_p9 }
  0x2f   : > { %p2955_p6 = pneg %p2954_p5 }
  0x30   : > { %2724 = dma.hbm_to_vmem [thread:$0]  (!%p3249_p7), %s3692_s1, 256, %s279_s21, [#allocation6]  }
  0x31   : > { %p2962_p3 = pnand %p2961_p13, %p2955_p6 }
  0x33   : > { %2965 = shalt.err (!%p2962_p3)
}
  0x34   : > { %s3693_s0 = sld [smem:[#allocation18_spill]]  ;;  %s3126_s21 = smov [#allocation7]  }
  0x35   : > { %s289_s24 = sshll.u32 %s3126_s21, 4  ;;  %s300_s26 = sand.u32 1, %s3118_s29   ;;  %s290_s24 = int_to_ptr.vmem [resolvable:$true] %s289_s24 }
  0x36   : > { %s2977_s10 = scalar_lea.vmem %s290_s24, 256  ;;  %p2985_p6 = scmp.lt.s32.totalorder %s290_s24, %s290_s24 }
  0x37   : > { %p2978_p11 = scmp.ne.s32.totalorder %s290_s24, %s2977_s10  ;;  %p2986_p13 = scmp.lt.s32.totalorder %s2977_s10, %s2977_s10 }
  0x39   : > { %p2980_p12 = pnand %p2978_p11, %p2916_p8  ;;  %p2987_p3 = por %p2986_p13, %p2985_p6 }
  0x3a   : > { %2721 = dma.hbm_to_vmem [thread:$0]  (!%p3249_p7), %s3693_s0, 512, %s268_s25, [#allocation3]  }
  0x3b   : > { %p2981_p1 = pneg %p2980_p12 }
  0x3d   : > { %p2988_p2 = pnand %p2987_p3, %p2981_p1 }
  0x3f   : > { %2991 = shalt.err (!%p2988_p2)
}
  0x40   : > { %2727 = dma.hbm_to_vmem [thread:$0]  (!%p3249_p7), %s3670_s2, 256, %s290_s24, [#allocation6]  }
  0x41   : > { %s2378_s25 = sshll.u32 %s300_s26, 10  ;;  %s2379_s15 = sshll.u32 %s3122_s30, 6 }
  0x42   : > { %s3290_s0 = scalar_lea.hbm %s3671_s3, %s2379_s15  ;;  %s304_s10 = scalar_lea.vmem [#allocation8], %s2378_s25 }
  0x43   : > { %s310_s1 = sshll.u32 %s304_s10, 4  ;;  %s3294_s22 = scalar_lea.sflag [#allocation9], %s300_s26  ;;  %s3292_s1 = int_to_ptr.vmem [resolvable:$true] %s310_s1 }
  0x44   : > { %s2992_s12 = scalar_lea.hbm %s3290_s0, 16384  ;;  %p3694_p0 = scmp.ne.s32.totalorder %s3691_s23, 0 }
  0x45   : > { %p2993_p8 = scmp.ne.s32.totalorder %s3290_s0, %s2992_s12  ;;  %s2997_s15 = scalar_lea.hbm %s3671_s3, 32768 }
  0x46   : > { %p2994_p7 = pneg %p3694_p0  ;;  %p2998_p9 = scmp.lt.s32.totalorder %s3290_s0, %s3671_s3 }
  0x47   : > { %p2999_p10 = scmp.lt.s32.totalorder %s2997_s15, %s2992_s12 }
  0x48   : > { %p2995_p4 = pnand %p2994_p7, %p2993_p8 }
  0x49   : > { %p3000_p11 = por %p2999_p10, %p2998_p9 }
  0x4a   : > { %p2996_p5 = pneg %p2995_p4 }
  0x4c   : > { %p3001_p12 = pnand %p3000_p11, %p2996_p5 }
  0x4e   : > { %3004 = shalt.err (!%p3001_p12)
}
  0x4f   : > { %s3005_s26 = scalar_lea.vmem %s3292_s1, 16384  ;;  %s3127_s25 = smov [#allocation8]  }
  0x50   : > { %p3006_p1 = scmp.ne.s32.totalorder %s3292_s1, %s3005_s26  ;;  %s3010_s10 = sshll.u32 %s3127_s25, 4  ;;  %s3011_s10 = int_to_ptr.vmem [resolvable:$false] %s3010_s10 }
  0x51   : > { %s3012_s24 = scalar_lea.vmem %s3011_s10, 32768  ;;  %p3013_p3 = scmp.lt.s32.totalorder %s3292_s1, %s3011_s10 }
  0x52   : > { %p3008_p6 = pnand %p3006_p1, %p2994_p7  ;;  %p3014_p2 = scmp.lt.s32.totalorder %s3012_s24, %s3005_s26 }
  0x54   : > { %p3009_p13 = pneg %p3008_p6  ;;  %p3015_p8 = por %p3014_p2, %p3013_p3 }
  0x56   : > { %p3016_p4 = pnand %p3015_p8, %p3009_p13 }
  0x58   : > { %3019 = shalt.err (!%p3016_p4)
}
  0x59   : > { %s3128_s12 = smov 128   ;;  %s3129_s13 = smov 64  }
  0x5a   : > { %s3130_s15 = smov 4   ;;  %p3695_p7 = scmp.ne.s32.totalorder %s3688_s19, 0 }
  0x5b   : > { %2731 = dma.hbm_to_vmem [thread:$0]  (!%p3694_p0), %s3290_s0, 16384, %s3292_s1, %s3294_s22, %s3128_s12, %s3129_s13, %s3130_s15  }
  0x5c   : > { %340 = sbr.rel (%p3695_p7) target bundleno = 472 (0x1d8), region = 48  ;;  %p3696_p5 = scmp.eq.s32.totalorder (!%p3695_p7), %s3200_s9, 0 }
  0x61   : > { %3089 = dma.done.wait (%p3696_p5), [#allocation3], 512   ;;  %p3697_p9 = pmov %p3696_p5 }
  0x62   : > { %p3698_p10 = pmov %p3696_p5 }
  0x63   : > { %3091 = vsyncadd (%p3697_p9), [#allocation3], 4294966784 }
  0x64   : > { %3093 = dma.done.wait (%p3698_p10), [#allocation6], 512   ;;  %p3699_p11 = pmov %p3696_p5 }
  0x65   : > { %s3326_s20 = sand.u32 1, %s3114_s28   ;;  %p3700_p0 = scmp.ne.s32.totalorder %s3685_s16, 0 }
  0x66   : > { %3095 = vsyncadd (%p3699_p11), [#allocation6], 4294966784  ;;  %s2384_s0 = sshll.u32 %s3326_s20, 10  ;;  %s355_s1 = scalar_lea.sflag [#allocation9], %s3326_s20 }
  0x67   : > { %s3330_s19 = scalar_lea.vmem [#allocation8], %s2384_s0 }
  0x68   : > { %3097 = dma.done.wait (%p3700_p0), %s355_s1, 16384  }
  0x69   : > { %3099 = vsyncadd (%p3700_p0), %s355_s1, 4294950912  ;;  %v2786_v0 = vld [vmem:[%s3330_s19 + $0x78] sm:$0xff]   ;;  %v2790_v4 = vld [vmem:[%s3330_s19 + $0x70] sm:$0xff]   ;;  %v423_v19 = vlaneseq  ;;  %v3131_v27 = vmov 1983009808   ;;  %p405_p12 = scmp.lt.s32.totalorder %s3200_s9, 1 }
  0x6a   : > { %v2787_v1 = vld [vmem:[%s3330_s19 + $0xf8] sm:$0xff]   ;;  %2524 = vmatprep.subr.bf16.mxu0 %v2786_v0  ;;  %v2791_v5 = vld [vmem:[%s3330_s19 + $0xf0] sm:$0xff]   ;;  %v2794_v8 = vld [vmem:[%s3330_s19 + $0x68] sm:$0xff]   ;;  %v490_v28 = vunpack.c.l.s4 %v3131_v27  ;;  %s2385_s26 = sshll.u32 %s3326_s20, 1  ;;  %s2520_s12 = sshll.u32 %s3200_s9, 5 }
  0x6b   : > { %v2788_v2 = vld [vmem:[%s3330_s19 + $0x38] sm:$0xff]   ;;  %2546 = vmatprep.subr.bf16.mxu1 %v2787_v1  ;;  %v2792_v6 = vld [vmem:[%s3330_s19 + $0x30] sm:$0xff]   ;;  %v2795_v9 = vld [vmem:[%s3330_s19 + $0xe8] sm:$0xff]   ;;  %v424_v24 = vshrl.u32 %v423_v19, 7  ;;  %s3580_s16 = scalar_select %p405_p12, %s3200_s9, 1 }
  0x6c   : > { %v2789_v3 = vld [vmem:[%s3330_s19 + $0xb8] sm:$0xff]   ;;  %2525 = vmatpush3.bf16.msra.mxu0 %v2788_v2  ;;  %v2793_v7 = vld [vmem:[%s3330_s19 + $0xb0] sm:$0xff]   ;;  %v2796_v10 = vld [vmem:[%s3330_s19 + $0x28] sm:$0xff]   ;;  %v491_v36 = vunpack.c.0.s8 %v490_v28  ;;  %s397_s13 = scalar_lea.vmem [#allocation10], %s2385_s26  ;;  %s2181_s10 = scalar_lea.sflag [#allocation4], %s3326_s20 }
  0x6d   : > { %2547 = vmatpush3.bf16.msra.mxu1 %v2789_v3  ;;  %2526 = vmatprep.subr.bf16.mxu0 %v2790_v4  ;;  %v2797_v11 = vld [vmem:[%s3330_s19 + $0xa8] sm:$0xff]   ;;  %v2798_v12 = vld [vmem:[%s3330_s19 + $0x60] sm:$0xff]   ;;  %v2802_v16 = vld [vmem:[%s3330_s19 + $0x58] sm:$0xff]   ;;  %v3363_v31 = vsub.s32 0, %v424_v24  ;;  %v3366_v33 = vsub.s32 1, %v424_v24  ;;  %v3369_v35 = vsub.s32 2, %v424_v24  ;;  %s407_s21 = scalar_lea.vmem %s3672_s4, %s3580_s16  ;;  %s410_s24 = scalar_lea.vmem %s3673_s5, %s3580_s16 }
  0x6e   : > { %2548 = vmatprep.subr.bf16.mxu1 %v2791_v5  ;;  %v2799_v13 = vld [vmem:[%s3330_s19 + $0xe0] sm:$0xff]   ;;  %v2803_v17 = vld [vmem:[%s3330_s19 + $0xd8] sm:$0xff]   ;;  %v2806_v21 = vld [vmem:[%s3330_s19 + $0x50] sm:$0xff]   ;;  %v3372_v38 = vsub.s32 3, %v424_v24  ;;  %v3378_v42 = vsub.s32 %v491_v36, %v424_v24  ;;  %v3405_v5 = vsub.s32 4, %v424_v24  ;;  %s2199_s15 = sshll.u32 %s397_s13, 4  ;;  %s3603_s15 = int_to_ptr.vmem [resolvable:$true] %s2199_s15 }
  0x6f   : > { %v2800_v14 = vld [vmem:[%s3330_s19 + $0x20] sm:$0xff]   ;;  %v2804_v18 = vld [vmem:[%s3330_s19 + $0x18] sm:$0xff]   ;;  %v2807_v22 = vld [vmem:[%s3330_s19 + $0xd0] sm:$0xff]   ;;  %p3701_p6 = scmp.ne.s32.totalorder %s3686_s17, 0  ;;  %s3132_s0 = smov [#allocation10]  }
  0x70   : > { %2527 = vmatpush3.bf16.msra.mxu0 %v2792_v6  ;;  %v2801_v15 = vld [vmem:[%s3330_s19 + $0xa0] sm:$0xff]   ;;  %v2805_v20 = vld [vmem:[%s3330_s19 + $0x98] sm:$0xff]   ;;  %v2808_v23 = vld [vmem:[%s3330_s19 + $0x10] sm:$0xff]   ;;  %v3407_v6 = vsub.s32 5, %v424_v24  ;;  %s3024_s1 = sshll.u32 %s3132_s0, 4  ;;  %s3025_s1 = int_to_ptr.vmem [resolvable:$false] %s3024_s1 }
  0x71   : > { %2549 = vmatpush3.bf16.msra.mxu1 %v2793_v7  ;;  %2528 = vmatprep.subr.bf16.mxu0 %v2794_v8  ;;  %v2809_v25 = vld [vmem:[%s3330_s19 + $0x90] sm:$0xff]   ;;  %v2810_v26 = vld [vmem:[%s3330_s19 + $0x48] sm:$0xff]   ;;  %v2814_v34 = vld [vmem:[%s3330_s19 + $0x40] sm:$0xff]   ;;  %v3409_v7 = vsub.s32 6, %v424_v24  ;;  %v3411_v8 = vsub.s32 7, %v424_v24  ;;  %s3026_s23 = scalar_lea.vmem %s3025_s1, 64  ;;  %p3027_p2 = scmp.lt.s32.totalorder %s3603_s15, %s3025_s1 }
  0x72   : > { %2550 = vmatprep.subr.bf16.mxu1 %v2795_v9  ;;  %v2811_v29 = vld [vmem:[%s3330_s19 + $0xc8] sm:$0xff]   ;;  %v2815_v37 = vld [vmem:[%s3330_s19 + $0xc0] sm:$0xff]   ;;  %v3380_v43 = vld [vmem:[#allocation7] sm:$0xff] }
  0x73   : > { %v2812_v30 = vld [vmem:[%s3330_s19 + $0x8] sm:$0xff]   ;;  %v2816_v39 = vld [vmem:[%s3330_s19] sm:$0xff]   ;;  %v2818_v48 = vld [vmem:[%s3330_s19 + $0x178] sm:$0xff]   ;;  %v570_v49 = vrot.slane %v3380_v43, %v3363_v31  ;;  %v574_v50 = vrot.slane %v3380_v43, %v3366_v33  ;;  %v578_v51 = vrot.slane %v3380_v43, %v3369_v35  ;;  %v582_v52 = vrot.slane %v3380_v43, %v3372_v38 }
  0x74   : > { %2529 = vmatpush3.bf16.msra.mxu0 %v2796_v10  ;;  %v2813_v32 = vld [vmem:[%s3330_s19 + $0x88] sm:$0xff]   ;;  %v2817_v40 = vld [vmem:[%s3330_s19 + $0x80] sm:$0xff]   ;;  %v2819_v53 = vld [vmem:[%s3330_s19 + $0x1f8] sm:$0xff]   ;;  %v594_v27 = vrot.slane %v3380_v43, %v3409_v7  ;;  %v598_v28 = vrot.slane %v3380_v43, %v3411_v8 }
  0x75   : > { %2551 = vmatpush3.bf16.msra.mxu1 %v2797_v11  ;;  %2530 = vmatprep.subr.bf16.mxu0 %v2798_v12  ;;  %v3376_v41 = vld [vmem:[#allocation5] sm:$0xff]  ;;  %v631_v56 = vcombine.low %v570_v49, %v574_v50  ;;  %v632_v57 = vcombine.low %v578_v51, %v582_v52  ;;  %v2820_v12 = vld [vmem:[%s3330_s19 + $0x138] sm:$0xff]   ;;  %v2824_v24 = vld [vmem:[%s3330_s19 + $0x130] sm:$0xff]  }
  0x76   : > { %2552 = vmatprep.subr.bf16.mxu1 %v2799_v13  ;;  %v426_v44 = vrot.slane %v3376_v41, %v3363_v31  ;;  %v430_v45 = vrot.slane %v3376_v41, %v3366_v33  ;;  %v434_v46 = vrot.slane %v3376_v41, %v3369_v35  ;;  %v438_v47 = vrot.slane %v3376_v41, %v3372_v38  ;;  %v415_v60 = vld [vmem:[#allocation2] sm:$0xff]  ;;  %v2827_v36 = vld [vmem:[%s3330_s19 + $0x1e8] sm:$0xff]   ;;  %v2834_v51 = vld [vmem:[%s3330_s19 + $0x158] sm:$0xff]  }
  0x77   : > { %v639_v61 = vrot.slane %v631_v56, %v3378_v42  ;;  %v646_v62 = vrot.slane %v632_v57, %v3378_v42  ;;  %v446_v19 = vrot.slane %v3376_v41, %v3407_v6  ;;  %v2833_v50 = vld [vmem:[%s3330_s19 + $0x1a0] sm:$0xff]   ;;  %v2837_v56 = vld [vmem:[%s3330_s19 + $0x198] sm:$0xff]   ;;  %v416_v57 = vld [vmem:[#allocation2 + $0x8] sm:$0xff] }
  0x78   : > { %2531 = vmatpush3.bf16.msra.mxu0 %v2800_v14  ;;  %v487_v54 = vcombine.low %v426_v44, %v430_v45  ;;  %v488_v55 = vcombine.low %v434_v46, %v438_v47  ;;  %v2831_v46 = vld [vmem:[%s3330_s19 + $0x1e0] sm:$0xff]  }
  0x79   : > { %2553 = vmatpush3.bf16.msra.mxu1 %v2801_v15  ;;  %2532 = vmatprep.subr.bf16.mxu0 %v2802_v16  ;;  %v647_v0 = vcombine.low %v639_v61, %v646_v62  ;;  %v2821_v15 = vld [vmem:[%s3330_s19 + $0x1b8] sm:$0xff]   ;;  %v442_v16 = vrot.slane %v3376_v41, %v3405_v5  ;;  %v2832_v47 = vld [vmem:[%s3330_s19 + $0x120] sm:$0xff]   ;;  %v2840_v61 = vld [vmem:[%s3330_s19 + $0x110] sm:$0xff]  }
  0x7a   : > { %2554 = vmatprep.subr.bf16.mxu1 %v2803_v17  ;;  %v495_v58 = vrot.slane %v487_v54, %v3378_v42  ;;  %v502_v59 = vrot.slane %v488_v55, %v3378_v42  ;;  %v2836_v54 = vld [vmem:[%s3330_s19 + $0x118] sm:$0xff]  }
  0x7c   : > { %2533 = vmatpush3.bf16.msra.mxu0 %v2804_v18  ;;  %v503_v63 = vcombine.low %v495_v58, %v502_v59  ;;  %v2822_v18 = vld [vmem:[%s3330_s19 + $0x170] sm:$0xff]  }
  0x7d   : > { %2555 = vmatpush3.bf16.msra.mxu1 %v2805_v20  ;;  %2534 = vmatprep.subr.bf16.mxu0 %v2806_v21  ;;  %v450_v20 = vrot.slane %v3376_v41, %v3409_v7  ;;  %v454_v21 = vrot.slane %v3376_v41, %v3411_v8  ;;  %v2829_v41 = vld [vmem:[%s3330_s19 + $0x1a8] sm:$0xff]   ;;  %v2838_v58 = vld [vmem:[%s3330_s19 + $0x150] sm:$0xff]  }
  0x7e   : > { %2556 = vmatprep.subr.bf16.mxu1 %v2807_v22  ;;  %v559_v1 = vmul.f32 %v503_v63, %v415_v60  ;;  %v2839_v60 = vld [vmem:[%s3330_s19 + $0x1d0] sm:$0xff]  }
  0x7f   : > { %v2841_v63 = vld [vmem:[%s3330_s19 + $0x190] sm:$0xff]  }
  0x80   : > { %2535 = vmatpush3.bf16.msra.mxu0 %v2808_v23  ;;  %v703_v2 = vadd.f32 %v647_v0, %v559_v1  ;;  %v2823_v23 = vld [vmem:[%s3330_s19 + $0x1f0] sm:$0xff]   ;;  %v2842_v0 = vld [vmem:[%s3330_s19 + $0x148] sm:$0xff]  }
  0x81   : > { %2557 = vmatpush3.bf16.msra.mxu1 %v2809_v25  ;;  %2536 = vmatprep.subr.bf16.mxu0 %v2810_v26  ;;  %v586_v25 = vrot.slane %v3380_v43, %v3405_v5  ;;  %v590_v26 = vrot.slane %v3380_v43, %v3407_v6  ;;  %v2830_v43 = vld [vmem:[%s3330_s19 + $0x160] sm:$0xff]  }
  0x82   : > { %2558 = vmatprep.subr.bf16.mxu1 %v2811_v29  ;;  %v718_v3 = vrot.slane %v703_v2, %v3378_v42  ;;  %v711_v4 = vcombine.high %v703_v2, %v703_v2  ;;  %v2825_v29 = vld [vmem:[%s3330_s19 + $0x1b0] sm:$0xff]  }
  0x84   : > { %2537 = vmatpush3.bf16.msra.mxu0 %v2812_v30  ;;  %v726_v9 = vcombine.high %v718_v3, %v718_v3  ;;  %v725_v10 = vrot.slane %v711_v4, %v3378_v42  ;;  %v795_v11 = vpack.c.bf16 %v718_v3, %v718_v3  ;;  %v2826_v30 = vld [vmem:[%s3330_s19 + $0x168] sm:$0xff]  }
  0x85   : > { %2559 = vmatpush3.bf16.msra.mxu1 %v2813_v32  ;;  %2538 = vmatprep.subr.bf16.mxu0 %v2814_v34  ;;  %v504_v32 = vcombine.low %v442_v16, %v446_v19  ;;  %v505_v34 = vcombine.low %v450_v20, %v454_v21  ;;  %v2843_v3 = vld [vmem:[%s3330_s19 + $0x1c8] sm:$0xff]   ;;  %v2848_v16 = vld [vmem:[%s3330_s19 + $0x100] sm:$0xff]   ;;  %v2850_v19 = vld [vmem:[%s3330_s19 + $0x278] sm:$0xff]  }
  0x86   : > { %2560 = vmatprep.subr.bf16.mxu1 %v2815_v37  ;;  %v796_v13 = vpack.c.bf16 %v726_v9, %v726_v9  ;;  %v727_v14 = vcombine.high %v725_v10, %v725_v10  ;;  %v797_v17 = vpack.c.bf16 %v725_v10, %v725_v10  ;;  %v2828_v37 = vld [vmem:[%s3330_s19 + $0x128] sm:$0xff]   ;;  %v2851_v20 = vld [vmem:[%s3330_s19 + $0x2f8] sm:$0xff]  }
  0x87   : > { %v512_v44 = vrot.slane %v504_v32, %v3378_v42  ;;  %v519_v45 = vrot.slane %v505_v34, %v3378_v42  ;;  %v2844_v4 = vld [vmem:[%s3330_s19 + $0x108] sm:$0xff]  }
  0x88   : > { %2539 = vmatpush3.bf16.msra.mxu0 %v2816_v39  ;;  %1874 = vmatprep.mubr.bf16.mxu0 %v796_v13  ;;  %v798_v22 = vpack.c.bf16 %v727_v14, %v727_v14  ;;  %v648_v39 = vcombine.low %v586_v25, %v590_v26  ;;  %v2854_v25 = vld [vmem:[%s3330_s19 + $0x270] sm:$0xff]   ;;  %v2860_v32 = vld [vmem:[%s3330_s19 + $0x228] sm:$0xff]  }
  0x89   : > { %2561 = vmatpush3.bf16.msra.mxu1 %v2817_v40  ;;  %2568 = vmatprep.subr.bf16.mxu0 %v2818_v48  ;;  %v649_v40 = vcombine.low %v594_v27, %v598_v28  ;;  %v520_v52 = vcombine.low %v512_v44, %v519_v45  ;;  %v2855_v26 = vld [vmem:[%s3330_s19 + $0x2f0] sm:$0xff]   ;;  %v2861_v34 = vld [vmem:[%s3330_s19 + $0x2a8] sm:$0xff]   ;;  %v2868_v44 = vld [vmem:[%s3330_s19 + $0x218] sm:$0xff]  }
  0x8a   : > { %2590 = vmatprep.subr.bf16.mxu1 %v2819_v53  ;;  %1914 = vmatprep.mubr.bf16.mxu1 %v798_v22  ;;  %v656_v48 = vrot.slane %v648_v39, %v3378_v42  ;;  %v2835_v53 = vld [vmem:[%s3330_s19 + $0x1d8] sm:$0xff]   ;;  %v2856_v27 = vld [vmem:[%s3330_s19 + $0x230] sm:$0xff]   ;;  %v2864_v39 = vld [vmem:[%s3330_s19 + $0x220] sm:$0xff]  }
  0x8b   : > { %1875 = vmatmul.mubr.bf16.vlgmr.msra.gmra.mxu0 %v795_v11  ;;  %v663_v49 = vrot.slane %v649_v40, %v3378_v42  ;;  %v560_v59 = vmul.f32 %v520_v52, %v416_v57  ;;  %v2845_v11 = vld [vmem:[%s3330_s19 + $0x188] sm:$0xff]   ;;  %v2852_v22 = vld [vmem:[%s3330_s19 + $0x238] sm:$0xff]   ;;  %v2857_v28 = vld [vmem:[%s3330_s19 + $0x2b0] sm:$0xff]  }
  0x8c   : > { %2569 = vmatpush3.bf16.msra.mxu0 %v2820_v12  ;;  %1915 = vmatmul.mubr.bf16.vlgmr.msra.gmra.mxu1 %v797_v17  ;;  %v2846_v12 = vld [vmem:[%s3330_s19 + $0x140] sm:$0xff]   ;;  %v2869_v45 = vld [vmem:[%s3330_s19 + $0x298] sm:$0xff]  }
  0x8d   : > { %2570 = vmatprep.subr.bf16.mxu0 %v2822_v18  ;;  %2591 = vmatpush3.bf16.msra.mxu1 %v2821_v15  ;;  %v664_v55 = vcombine.low %v656_v48, %v663_v49  ;;  %v2847_v15 = vld [vmem:[%s3330_s19 + $0x1c0] sm:$0xff]   ;;  %v3497_v52 = vld [vmem:[#allocation7 + $0x8] sm:$0xff] }
  0x8e   : > { %2592 = vmatprep.subr.bf16.mxu1 %v2823_v23  ;;  %v2849_v18 = vld [vmem:[%s3330_s19 + $0x180] sm:$0xff]   ;;  %v2853_v23 = vld [vmem:[%s3330_s19 + $0x2b8] sm:$0xff]   ;;  %v614_v57 = vrot.slane %v3497_v52, %v3372_v38 }
  0x8f   : > { %v704_v62 = vadd.f32 %v664_v55, %v560_v59  ;;  %v2865_v40 = vld [vmem:[%s3330_s19 + $0x2a0] sm:$0xff]   ;;  %v606_v55 = vrot.slane %v3497_v52, %v3366_v33 }
  0x90   : > { %2571 = vmatpush3.bf16.msra.mxu0 %v2824_v24 }
  0x91   : > { %2572 = vmatprep.subr.bf16.mxu0 %v2826_v30  ;;  %2593 = vmatpush3.bf16.msra.mxu1 %v2825_v29  ;;  %v735_v1 = vrot.slane %v704_v62, %v3378_v42  ;;  %v728_v2 = vcombine.high %v704_v62, %v704_v62  ;;  %v2858_v29 = vld [vmem:[%s3330_s19 + $0x268] sm:$0xff]  }
  0x92   : > { %2594 = vmatprep.subr.bf16.mxu1 %v2827_v36  ;;  %v2859_v30 = vld [vmem:[%s3330_s19 + $0x2e8] sm:$0xff]   ;;  %v2862_v36 = vld [vmem:[%s3330_s19 + $0x260] sm:$0xff]  }
  0x93   : > { %v743_v9 = vcombine.high %v735_v1, %v735_v1  ;;  %v742_v10 = vrot.slane %v728_v2, %v3378_v42  ;;  %v799_v21 = vpack.c.bf16 %v735_v1, %v735_v1  ;;  %v2875_v2 = vld [vmem:[%s3330_s19 + $0x2c8] sm:$0xff]  }
  0x94   : > { %2573 = vmatpush3.bf16.msra.mxu0 %v2828_v37  ;;  %v2863_v37 = vld [vmem:[%s3330_s19 + $0x2e0] sm:$0xff]  }
  0x95   : > { %2574 = vmatprep.subr.bf16.mxu0 %v2830_v43  ;;  %2595 = vmatpush3.bf16.msra.mxu1 %v2829_v41  ;;  %v800_v13 = vpack.c.bf16 %v743_v9, %v743_v9  ;;  %v744_v14 = vcombine.high %v742_v10, %v742_v10  ;;  %v801_v24 = vpack.c.bf16 %v742_v10, %v742_v10  ;;  %v2866_v41 = vld [vmem:[%s3330_s19 + $0x258] sm:$0xff]   ;;  %v2878_v10 = vld [vmem:[%s3330_s19 + $0x240] sm:$0xff]  }
  0x96   : > { %2596 = vmatprep.subr.bf16.mxu1 %v2831_v46  ;;  %v2867_v43 = vld [vmem:[%s3330_s19 + $0x2d8] sm:$0xff]   ;;  %v2870_v46 = vld [vmem:[%s3330_s19 + $0x250] sm:$0xff]  }
  0x97   : > { %1954 = vmatprep.mubr.bf16.mxu0 %v800_v13  ;;  %v802_v17 = vpack.c.bf16 %v744_v14, %v744_v14  ;;  %v2879_v13 = vld [vmem:[%s3330_s19 + $0x2c0] sm:$0xff]  }
  0x98   : > { %2575 = vmatpush3.bf16.msra.mxu0 %v2832_v47  ;;  %v3487_v47 = vld [vmem:[#allocation5 + $0x8] sm:$0xff] }
  0x99   : > { %2576 = vmatprep.subr.bf16.mxu0 %v2834_v51  ;;  %2597 = vmatpush3.bf16.msra.mxu1 %v2833_v50  ;;  %v458_v48 = vrot.slane %v3487_v47, %v3363_v31  ;;  %v462_v49 = vrot.slane %v3487_v47, %v3366_v33  ;;  %v466_v50 = vrot.slane %v3487_v47, %v3369_v35 }
  0x9a   : > { %2598 = vmatprep.subr.bf16.mxu1 %v2835_v53  ;;  %1994 = vmatprep.mubr.bf16.mxu1 %v802_v17  ;;  %v470_v51 = vrot.slane %v3487_v47, %v3372_v38  ;;  %v2871_v53 = vld [vmem:[%s3330_s19 + $0x2d0] sm:$0xff]  }
  0x9b   : > { %v521_v59 = vcombine.low %v458_v48, %v462_v49  ;;  %v417_v38 = vld [vmem:[#allocation2 + $0x10] sm:$0xff]  ;;  %v2891_v48 = vld [vmem:[%s3330_s19 + $0x3e8] sm:$0xff]  }
  0x9c   : > { %2577 = vmatpush3.bf16.msra.mxu0 %v2836_v54  ;;  %v602_v54 = vrot.slane %v3497_v52, %v3363_v31  ;;  %v2874_v31 = vld [vmem:[%s3330_s19 + $0x248] sm:$0xff]  }
  0x9d   : > { %2578 = vmatprep.subr.bf16.mxu0 %v2838_v58  ;;  %2599 = vmatpush3.bf16.msra.mxu1 %v2837_v56  ;;  %v610_v56 = vrot.slane %v3497_v52, %v3369_v35  ;;  %v2872_v58 = vld [vmem:[%s3330_s19 + $0x210] sm:$0xff]   ;;  %v529_v33 = vrot.slane %v521_v59, %v3378_v42 }
  0x9e   : > { %2600 = vmatprep.subr.bf16.mxu1 %v2839_v60  ;;  %v522_v60 = vcombine.low %v466_v50, %v470_v51  ;;  %v665_v62 = vcombine.low %v602_v54, %v606_v55  ;;  %v2894_v50 = vld [vmem:[%s3330_s19 + $0x360] sm:$0xff]  }
  0x9f   : > { %v2895_v54 = vld [vmem:[%s3330_s19 + $0x3e0] sm:$0xff]  }
  0xa0   : > { %2579 = vmatpush3.bf16.msra.mxu0 %v2840_v61  ;;  %v2873_v61 = vld [vmem:[%s3330_s19 + $0x290] sm:$0xff]   ;;  %v536_v35 = vrot.slane %v522_v60, %v3378_v42  ;;  %v2897_v60 = vld [vmem:[%s3330_s19 + $0x3a0] sm:$0xff]  }
  0xa1   : > { %2580 = vmatprep.subr.bf16.mxu0 %v2842_v0  ;;  %2601 = vmatpush3.bf16.msra.mxu1 %v2841_v63  ;;  %v666_v63 = vcombine.low %v610_v56, %v614_v57  ;;  %v673_v0 = vrot.slane %v665_v62, %v3378_v42  ;;  %v2896_v57 = vld [vmem:[%s3330_s19 + $0x320] sm:$0xff]  }
  0xa2   : > { %2602 = vmatprep.subr.bf16.mxu1 %v2843_v3  ;;  %v537_v3 = vcombine.low %v529_v33, %v536_v35  ;;  %v2902_v33 = vld [vmem:[%s3330_s19 + $0x350] sm:$0xff]  }
  0xa3   : > { %v680_v1 = vrot.slane %v666_v63, %v3378_v42  ;;  %v2900_v63 = vld [vmem:[%s3330_s19 + $0x318] sm:$0xff]  }
  0xa4   : > { %2581 = vmatpush3.bf16.msra.mxu0 %v2844_v4  ;;  %v2876_v4 = vld [vmem:[%s3330_s19 + $0x208] sm:$0xff]  }
  0xa5   : > { %2582 = vmatprep.subr.bf16.mxu0 %v2846_v12  ;;  %2603 = vmatpush3.bf16.msra.mxu1 %v2845_v11  ;;  %v681_v9 = vcombine.low %v673_v0, %v680_v1  ;;  %v561_v11 = vmul.f32 %v537_v3, %v417_v38  ;;  %v2877_v12 = vld [vmem:[%s3330_s19 + $0x288] sm:$0xff]   ;;  %v2901_v38 = vld [vmem:[%s3330_s19 + $0x398] sm:$0xff]   ;;  %v2903_v0 = vld [vmem:[%s3330_s19 + $0x3d0] sm:$0xff]  }
  0xa6   : > { %2604 = vmatprep.subr.bf16.mxu1 %v2847_v15  ;;  %v2880_v15 = vld [vmem:[%s3330_s19 + $0x200] sm:$0xff]   ;;  %v2906_v3 = vld [vmem:[%s3330_s19 + $0x348] sm:$0xff]  }
  0xa7   : > { %v705_v14 = vadd.f32 %v681_v9, %v561_v11  ;;  %v2907_v11 = vld [vmem:[%s3330_s19 + $0x3c8] sm:$0xff]  }
  0xa8   : > { %2583 = vmatpush3.bf16.msra.mxu0 %v2848_v16 }
  0xa9   : > { %2612 = vmatprep.subr.bf16.mxu0 %v2850_v19  ;;  %2605 = vmatpush3.bf16.msra.mxu1 %v2849_v18  ;;  %v752_v16 = vrot.slane %v705_v14, %v3378_v42  ;;  %v745_v17 = vcombine.high %v705_v14, %v705_v14  ;;  %v2882_v18 = vld [vmem:[%s3330_s19 + $0x378] sm:$0xff]   ;;  %v2881_v19 = vld [vmem:[%s3330_s19 + $0x280] sm:$0xff]   ;;  %v2908_v14 = vld [vmem:[%s3330_s19 + $0x308] sm:$0xff]  }
  0xaa   : > { %2634 = vmatprep.subr.bf16.mxu1 %v2851_v20 }
  0xab   : > { %1955 = vmatmul.mubr.bf16.vlgmr.msra.gmra.mxu0 %v799_v21  ;;  %v760_v20 = vcombine.high %v752_v16, %v752_v16  ;;  %v759_v21 = vrot.slane %v745_v17, %v3378_v42 }
  0xac   : > { %2613 = vmatpush3.bf16.msra.mxu0 %v2852_v22  ;;  %1995 = vmatmul.mubr.bf16.vlgmr.msra.gmra.mxu1 %v801_v24  ;;  %v2883_v22 = vld [vmem:[%s3330_s19 + $0x3f8] sm:$0xff]  }
  0xad   : > { %2614 = vmatprep.subr.bf16.mxu0 %v2854_v25  ;;  %2635 = vmatpush3.bf16.msra.mxu1 %v2853_v23  ;;  %v803_v23 = vpack.c.bf16 %v752_v16, %v752_v16  ;;  %v804_v24 = vpack.c.bf16 %v760_v20, %v760_v20  ;;  %v761_v25 = vcombine.high %v759_v21, %v759_v21 }
  0xae   : > { %2636 = vmatprep.subr.bf16.mxu1 %v2855_v26  ;;  %v2884_v26 = vld [vmem:[%s3330_s19 + $0x338] sm:$0xff]  }
  0xaf   : > { %2034 = vmatprep.mubr.bf16.mxu0 %v804_v24 }
  0xb0   : > { %2615 = vmatpush3.bf16.msra.mxu0 %v2856_v27  ;;  %v474_v27 = vrot.slane %v3487_v47, %v3405_v5 }
  0xb1   : > { %2616 = vmatprep.subr.bf16.mxu0 %v2858_v29  ;;  %2637 = vmatpush3.bf16.msra.mxu1 %v2857_v28  ;;  %v805_v28 = vpack.c.bf16 %v759_v21, %v759_v21  ;;  %v2886_v29 = vld [vmem:[%s3330_s19 + $0x370] sm:$0xff]   ;;  %v2912_v21 = vld [vmem:[%s3330_s19 + $0x300] sm:$0xff]  }
  0xb2   : > { %2638 = vmatprep.subr.bf16.mxu1 %v2859_v30  ;;  %v478_v30 = vrot.slane %v3487_v47, %v3407_v6 }
  0xb4   : > { %2617 = vmatpush3.bf16.msra.mxu0 %v2860_v32  ;;  %v482_v32 = vrot.slane %v3487_v47, %v3409_v7 }
  0xb5   : > { %2618 = vmatprep.subr.bf16.mxu0 %v2862_v36  ;;  %2639 = vmatpush3.bf16.msra.mxu1 %v2861_v34  ;;  %v486_v34 = vrot.slane %v3487_v47, %v3411_v8  ;;  %v806_v36 = vpack.c.bf16 %v761_v25, %v761_v25  ;;  %v538_v47 = vcombine.low %v474_v27, %v478_v30 }
  0xb6   : > { %2640 = vmatprep.subr.bf16.mxu1 %v2863_v37  ;;  %v2885_v37 = vld [vmem:[%s3330_s19 + $0x3b8] sm:$0xff]  }
  0xb7   : > { %2074 = vmatprep.mubr.bf16.mxu1 %v806_v36  ;;  %v546_v51 = vrot.slane %v538_v47, %v3378_v42 }
  0xb8   : > { %2619 = vmatpush3.bf16.msra.mxu0 %v2864_v39  ;;  %v2887_v39 = vld [vmem:[%s3330_s19 + $0x3f0] sm:$0xff]  }
  0xb9   : > { %2620 = vmatprep.subr.bf16.mxu0 %v2866_v41  ;;  %2641 = vmatpush3.bf16.msra.mxu1 %v2865_v40  ;;  %v618_v40 = vrot.slane %v3497_v52, %v3405_v5  ;;  %v622_v41 = vrot.slane %v3497_v52, %v3407_v6  ;;  %v539_v5 = vcombine.low %v482_v32, %v486_v34  ;;  %v2889_v6 = vld [vmem:[%s3330_s19 + $0x3b0] sm:$0xff]  }
  0xba   : > { %2642 = vmatprep.subr.bf16.mxu1 %v2867_v43  ;;  %v626_v43 = vrot.slane %v3497_v52, %v3409_v7 }
  0xbb   : > { %v682_v7 = vcombine.low %v618_v40, %v622_v41 }
  0xbc   : > { %2621 = vmatpush3.bf16.msra.mxu0 %v2868_v44  ;;  %v630_v44 = vrot.slane %v3497_v52, %v3411_v8  ;;  %v2892_v8 = vld [vmem:[%s3330_s19 + $0x328] sm:$0xff]   ;;  %v553_v52 = vrot.slane %v539_v5, %v3378_v42 }
  0xbd   : > { %2622 = vmatprep.subr.bf16.mxu0 %v2870_v46  ;;  %2643 = vmatpush3.bf16.msra.mxu1 %v2869_v45  ;;  %v2888_v45 = vld [vmem:[%s3330_s19 + $0x330] sm:$0xff]   ;;  %v2890_v46 = vld [vmem:[%s3330_s19 + $0x368] sm:$0xff]   ;;  %v690_v55 = vrot.slane %v682_v7, %v3378_v42 }
  0xbe   : > { %2644 = vmatprep.subr.bf16.mxu1 %v2871_v53  ;;  %v683_v49 = vcombine.low %v626_v43, %v630_v44  ;;  %v2893_v53 = vld [vmem:[%s3330_s19 + $0x3a8] sm:$0xff]   ;;  %v554_v59 = vcombine.low %v546_v51, %v553_v52 }
  0xc0   : > { %2623 = vmatpush3.bf16.msra.mxu0 %v2872_v58  ;;  %v697_v56 = vrot.slane %v683_v49, %v3378_v42  ;;  %v2898_v58 = vld [vmem:[%s3330_s19 + $0x358] sm:$0xff]  }
  0xc1   : > { %2624 = vmatprep.subr.bf16.mxu0 %v2874_v31  ;;  %2645 = vmatpush3.bf16.msra.mxu1 %v2873_v61  ;;  %v2899_v61 = vld [vmem:[%s3330_s19 + $0x3d8] sm:$0xff]  }
  0xc2   : > { %2646 = vmatprep.subr.bf16.mxu1 %v2875_v2  ;;  %v698_v62 = vcombine.low %v690_v55, %v697_v56  ;;  %v418_v31 = vld [vmem:[#allocation2 + $0x18] sm:$0xff]  ;;  %v2904_v2 = vld [vmem:[%s3330_s19 + $0x310] sm:$0xff]  }
  0xc3   : > { %v562_v35 = vmul.f32 %v554_v59, %v418_v31 }
  0xc4   : > { %2625 = vmatpush3.bf16.msra.mxu0 %v2876_v4 }
  0xc5   : > { %2626 = vmatprep.subr.bf16.mxu0 %v2878_v10  ;;  %2647 = vmatpush3.bf16.msra.mxu1 %v2877_v12  ;;  %v706_v1 = vadd.f32 %v698_v62, %v562_v35  ;;  %v2905_v10 = vld [vmem:[%s3330_s19 + $0x390] sm:$0xff]  }
  0xc6   : > { %2648 = vmatprep.subr.bf16.mxu1 %v2879_v13 }
  0xc7   : > { %v769_v4 = vrot.slane %v706_v1, %v3378_v42  ;;  %v762_v9 = vcombine.high %v706_v1, %v706_v1 }
  0xc8   : > { %2627 = vmatpush3.bf16.msra.mxu0 %v2880_v15  ;;  %v2910_v15 = vld [vmem:[%s3330_s19 + $0x340] sm:$0xff]  }
  0xc9   : > { %2656 = vmatprep.subr.bf16.mxu0 %v2882_v18  ;;  %2649 = vmatpush3.bf16.msra.mxu1 %v2881_v19  ;;  %v777_v12 = vcombine.high %v769_v4, %v769_v4  ;;  %v776_v13 = vrot.slane %v762_v9, %v3378_v42  ;;  %v2909_v18 = vld [vmem:[%s3330_s19 + $0x388] sm:$0xff]   ;;  %v2911_v19 = vld [vmem:[%s3330_s19 + $0x3c0] sm:$0xff]  }
  0xca   : > { %2678 = vmatprep.subr.bf16.mxu1 %v2883_v22  ;;  %v2913_v42 = vld [vmem:[%s3330_s19 + $0x380] sm:$0xff]   ;;  %v807_v22 = vpack.c.bf16 %v769_v4, %v769_v4  ;;  %s413_s19 = scalar_lea.vmem %s3674_s6, %s3580_s16  ;;  %s3605_s16 = scalar_lea.vmem [#allocation11], %s2385_s26 }
  0xcb   : > { %2035 = vmatmul.mubr.bf16.vlgmr.msra.gmra.mxu0 %v803_v23  ;;  %v808_v16 = vpack.c.bf16 %v777_v12, %v777_v12  ;;  %v778_v17 = vcombine.high %v776_v13, %v776_v13  ;;  %v809_v23 = vpack.c.bf16 %v776_v13, %v776_v13 }
  0xcc   : > { %2657 = vmatpush3.bf16.msra.mxu0 %v2884_v26  ;;  %2075 = vmatmul.mubr.bf16.vlgmr.msra.gmra.mxu1 %v805_v28  ;;  %v2387_v26 = vld [vmem:[%s407_s21] ss:$0 sm:$0xff]  ;;  %s3601_s21 = scalar_lea.hbm %s3675_s7, %s2520_s12 }
  0xcd   : > { %2658 = vmatprep.subr.bf16.mxu0 %v2886_v29  ;;  %2679 = vmatpush3.bf16.msra.mxu1 %v2885_v37  ;;  %v810_v20 = vpack.c.bf16 %v778_v17, %v778_v17 }
  0xce   : > { %2680 = vmatprep.subr.bf16.mxu1 %v2887_v39  ;;  %2114 = vmatprep.mubr.bf16.mxu0 %v808_v16 }
  0xcf   : > { %2154 = vmatprep.mubr.bf16.mxu1 %v810_v20 }
  0xd0   : > { %2659 = vmatpush3.bf16.msra.mxu0 %v2888_v45 }
  0xd1   : > { %2660 = vmatprep.subr.bf16.mxu0 %v2890_v46  ;;  %2681 = vmatpush3.bf16.msra.mxu1 %v2889_v6 }
  0xd2   : > { %2682 = vmatprep.subr.bf16.mxu1 %v2891_v48 }
  0xd4   : > { %2661 = vmatpush3.bf16.msra.mxu0 %v2892_v8 }
  0xd5   : > { %2662 = vmatprep.subr.bf16.mxu0 %v2894_v50  ;;  %2683 = vmatpush3.bf16.msra.mxu1 %v2893_v53 }
  0xd6   : > { %2684 = vmatprep.subr.bf16.mxu1 %v2895_v54 }
  0xd8   : > { %2663 = vmatpush3.bf16.msra.mxu0 %v2896_v57 }
  0xd9   : > { %2664 = vmatprep.subr.bf16.mxu0 %v2898_v58  ;;  %2685 = vmatpush3.bf16.msra.mxu1 %v2897_v60 }
  0xda   : > { %2686 = vmatprep.subr.bf16.mxu1 %v2899_v61 }
  0xdc   : > { %2665 = vmatpush3.bf16.msra.mxu0 %v2900_v63 }
  0xdd   : > { %2666 = vmatprep.subr.bf16.mxu0 %v2902_v33  ;;  %2687 = vmatpush3.bf16.msra.mxu1 %v2901_v38 }
  0xde   : > { %2688 = vmatprep.subr.bf16.mxu1 %v2903_v0 }
  0xe0   : > { %2667 = vmatpush3.bf16.msra.mxu0 %v2904_v2  ;;  %v2516_v2 = vld [vmem:[%s410_s24] ss:$0 sm:$0xff]  ;;  %s3020_s24 = scalar_lea.vmem %s3603_s15, 32 }
  0xe1   : > { %2668 = vmatprep.subr.bf16.mxu0 %v2906_v3  ;;  %2689 = vmatpush3.bf16.msra.mxu1 %v2905_v10  ;;  %v2517_v10 = vld [vmem:[%s413_s19] ss:$0 sm:$0xff]  ;;  %p3021_p1 = scmp.ne.s32.totalorder %s3603_s15, %s3020_s24  ;;  %p3028_p8 = scmp.lt.s32.totalorder %s3026_s23, %s3020_s24 }
  0xe2   : > { %2690 = vmatprep.subr.bf16.mxu1 %v2907_v11 }
  0xe3   : > { %p3022_p13 = pnand %p3021_p1, %p3701_p6  ;;  %p3029_p4 = por %p3028_p8, %p3027_p2 }
  0xe4   : > { %2669 = vmatpush3.bf16.msra.mxu0 %v2908_v14 }
  0xe5   : > { %2670 = vmatprep.subr.bf16.mxu0 %v2910_v15  ;;  %2691 = vmatpush3.bf16.msra.mxu1 %v2909_v18  ;;  %p3023_p3 = pneg %p3022_p13 }
  0xe6   : > { %2692 = vmatprep.subr.bf16.mxu1 %v2911_v19 }
  0xe7   : > { %p3030_p7 = pnand %p3029_p4, %p3023_p3 }
  0xe8   : > { %2671 = vmatpush3.bf16.msra.mxu0 %v2912_v21 }
  0xe9   : > { %2693 = vmatpush3.bf16.msra.mxu1 %v2913_v42 }
  0xeb   : > { %2115 = vmatmul.mubr.bf16.vlgmr.msra.gmra.mxu0 %v807_v22 }
  0xec   : > { %2155 = vmatmul.mubr.bf16.vlgmr.msra.gmra.mxu1 %v809_v23 }
 0x14b   : > { %v2540_v24 = vpop.f32.mrf.mxu0 }
 0x14c   : > { %v2562_v25 = vpop.f32.mrf.mxu1 }
 0x14d   : > { %v2541_v27 = vpop.f32.mrf.mxu0 }
 0x14e   : > { %v2542_v28 = vadd.f32 %v2541_v27, %v2540_v24  ;;  %v2563_v29 = vpop.f32.mrf.mxu1 }
 0x14f   : > { %v2543_v30 = vpop.f32.mrf.mxu0  ;;  %v2564_v34 = vadd.f32 %v2563_v29, %v2562_v25 }
 0x150   : > { %v1877_v32 = vadd.f32 %v2542_v28, %v2387_v26  ;;  %v2565_v36 = vpop.f32.mrf.mxu1 }
 0x151   : > { %v2544_v37 = vpop.f32.mrf.mxu0 }
 0x152   : > { %v1917_v39 = vadd.f32 %v2564_v34, %v1877_v32  ;;  %v2566_v40 = vpop.f32.mrf.mxu1 }
 0x16b   : > { %v2584_v41 = vpop.f32.mrf.mxu0 }
 0x16c   : > { %v2606_v43 = vpop.f32.mrf.mxu1 }
 0x16d   : > { %v2585_v44 = vpop.f32.mrf.mxu0 }
 0x16e   : > { %v2607_v45 = vpop.f32.mrf.mxu1  ;;  %v2586_v54 = vadd.f32 %v2585_v44, %v2584_v41 }
 0x16f   : > { %v2587_v46 = vpop.f32.mrf.mxu0  ;;  %v2608_v56 = vadd.f32 %v2607_v45, %v2606_v43 }
 0x170   : > { %v2609_v47 = vpop.f32.mrf.mxu1  ;;  %v1957_v55 = vadd.f32 %v2586_v54, %v1917_v39 }
 0x171   : > { %v2588_v5 = vpop.f32.mrf.mxu0 }
 0x172   : > { %v2610_v6 = vpop.f32.mrf.mxu1  ;;  %v1997_v58 = vadd.f32 %v2608_v56, %v1957_v55 }
 0x18b   : > { %v2628_v48 = vpop.f32.mrf.mxu0 }
 0x18c   : > { %v2650_v7 = vpop.f32.mrf.mxu1 }
 0x18d   : > { %v2629_v49 = vpop.f32.mrf.mxu0 }
 0x18e   : > { %v2651_v8 = vpop.f32.mrf.mxu1  ;;  %v2630_v57 = vadd.f32 %v2629_v49, %v2628_v48 }
 0x18f   : > { %v2631_v50 = vpop.f32.mrf.mxu0  ;;  %v2652_v60 = vadd.f32 %v2651_v8, %v2650_v7 }
 0x190   : > { %v2653_v51 = vpop.f32.mrf.mxu1  ;;  %v2037_v59 = vadd.f32 %v2630_v57, %v1997_v58 }
 0x191   : > { %v2632_v52 = vpop.f32.mrf.mxu0 }
 0x192   : > { %v2654_v53 = vpop.f32.mrf.mxu1  ;;  %v2077_v31 = vadd.f32 %v2652_v60, %v2037_v59 }
 0x1ab   : > { %v2672_v61 = vpop.f32.mrf.mxu0 }
 0x1ac   : > { %v2694_v62 = vpop.f32.mrf.mxu1 }
 0x1ad   : > { %v2673_v63 = vpop.f32.mrf.mxu0 }
 0x1ae   : > { %v2674_v33 = vadd.f32 %v2673_v63, %v2672_v61  ;;  %v2695_v35 = vpop.f32.mrf.mxu1 }
 0x1af   : > { %v2675_v38 = vpop.f32.mrf.mxu0  ;;  %v2696_v1 = vadd.f32 %v2695_v35, %v2694_v62 }
 0x1b0   : > { %v2117_v0 = vadd.f32 %v2674_v33, %v2077_v31  ;;  %v2697_v3 = vpop.f32.mrf.mxu1 }
 0x1b1   : > { %v2676_v4 = vpop.f32.mrf.mxu0 }
 0x1b2   : > { %v2157_v9 = vadd.f32 %v2696_v1, %v2117_v0  ;;  %v2698_v11 = vpop.f32.mrf.mxu1 }
 0x1b4   : > { %v2170_v12 = vmul.f32 %v2516_v2, %v2157_v9  ;;  %2162 = vst [vmem:[%s397_s13] sm:$0x3] %v2157_v9 }
 0x1b5   : > { %3033 = shalt.err (!%p3030_p7)
}
 0x1b6   : > { %s3034_s26 = scalar_lea.hbm %s3601_s21, 32  ;;  %s3038_s22 = scalar_lea.hbm %s3675_s7, 64 }
 0x1b7   : > { %p3035_p5 = scmp.ne.s32.totalorder %s3601_s21, %s3034_s26  ;;  %p3039_p11 = scmp.lt.s32.totalorder %s3601_s21, %s3675_s7 }
 0x1b8   : > { %p3040_p0 = scmp.lt.s32.totalorder %s3038_s22, %s3034_s26 }
 0x1b9   : > { %p3036_p9 = pnand %p3035_p5, %p3701_p6 }
 0x1ba   : > { %p3041_p12 = por %p3040_p0, %p3039_p11 }
 0x1bb   : > { %p3037_p10 = pneg %p3036_p9 }
 0x1bd   : > { %p3042_p1 = pnand %p3041_p12, %p3037_p10 }
 0x1bf   : > { %3045 = shalt.err (!%p3042_p1)
}
 0x1c0   : > { %2714 = dma.vmem_to_hbm [thread:$0]  (%p3701_p6), %s3603_s15, 32, %s3601_s21, %s2181_s10   ;;  %v2178_v13 = vadd.f32 %v2517_v10, %v2170_v12 }
 0x1c1   : > { %s2210_s25 = scalar_lea.hbm %s3676_s8, %s2520_s12  ;;  %s3702_s23 = sshll.u32 %s3605_s16, 4  ;;  %s2213_s23 = int_to_ptr.vmem [resolvable:$true] %s3702_s23 }
 0x1c2   : > { %2179 = vst [vmem:[%s3605_s16] sm:$0x3] %v2178_v13  ;;  %s2186_s26 = scalar_lea.sflag [#allocation12], %s3326_s20  ;;  %s3046_s13 = scalar_lea.vmem %s2213_s23, 32 }
 0x1c3   : > { %p3047_p13 = scmp.ne.s32.totalorder %s2213_s23, %s3046_s13  ;;  %s3133_s19 = smov [#allocation11]  }
 0x1c4   : > { %s3050_s22 = sshll.u32 %s3133_s19, 4  ;;  %s3051_s22 = int_to_ptr.vmem [resolvable:$false] %s3050_s22 }
 0x1c5   : > { %p3048_p3 = pnand %p3047_p13, %p3701_p6  ;;  %s3052_s0 = scalar_lea.vmem %s3051_s22, 64 }
 0x1c6   : > { %p3053_p8 = scmp.lt.s32.totalorder %s2213_s23, %s3051_s22  ;;  %p3054_p4 = scmp.lt.s32.totalorder %s3052_s0, %s3046_s13 }
 0x1c7   : > { %p3049_p2 = pneg %p3048_p3 }
 0x1c8   : > { %p3055_p7 = por %p3054_p4, %p3053_p8 }
 0x1ca   : > { %p3056_p5 = pnand %p3055_p7, %p3049_p2 }
 0x1cc   : > { %3059 = shalt.err (!%p3056_p5)
}
 0x1cd   : > { %s3060_s9 = scalar_lea.hbm %s2210_s25, 32  ;;  %s3064_s15 = scalar_lea.hbm %s3676_s8, 64 }
 0x1ce   : > { %p3061_p9 = scmp.ne.s32.totalorder %s2210_s25, %s3060_s9  ;;  %p3065_p0 = scmp.lt.s32.totalorder %s2210_s25, %s3676_s8 }
 0x1cf   : > { %p3066_p12 = scmp.lt.s32.totalorder %s3064_s15, %s3060_s9 }
 0x1d0   : > { %p3062_p10 = pnand %p3061_p9, %p3701_p6 }
 0x1d1   : > { %p3067_p1 = por %p3066_p12, %p3065_p0 }
 0x1d2   : > { %p3063_p11 = pneg %p3062_p10 }
 0x1d4   : > { %p3068_p13 = pnand %p3067_p1, %p3063_p11 }
 0x1d6   : > { %3071 = shalt.err (!%p3068_p13)
}
 0x1d7   : > { %2715 = dma.vmem_to_hbm [thread:$0]  (%p3701_p6), %s2213_s23, 32, %s2210_s25, %s2186_s26  }
 0x1d8 PF: > { %s2224_s10 = sand.u32 1, %s3110_s27   ;;  %p3703_p3 = scmp.ne.s32.totalorder %s3687_s18, 0 }
 0x1d9   : > { %p3704_p2 = scmp.ge.s32.totalorder %s3122_s30, 2  ;;  %s2225_s24 = scalar_lea.sflag [#allocation4], %s2224_s10 }
 0x1db   : > { %p2733_p8 = pnand %p3704_p2, %p3703_p3 }
 0x1dd   : > { %p2734_p4 = pneg %p2733_p8 }
 0x1df   : > { %3101 = dma.done.wait (%p2734_p4), %s2225_s24, 32  }
 0x1e0   : > { %3103 = vsyncadd (%p2734_p4), %s2225_s24, 4294967264  ;;  %s2234_s1 = scalar_lea.sflag [#allocation12], %s2224_s10 }
 0x1e1   : > { %3105 = dma.done.wait (%p2734_p4), %s2234_s1, 32  }
 0x1e2   : > { %3107 = vsyncadd (%p2734_p4), %s2234_s1, 4294967264  ;;  %p27_p6 = scmp.ge.s32.totalorder %s3204_s11, 4   ;;  %s3705_s27 = smov %s3114_s28 }
 0x1e3   : > { %s3706_s28 = smov %s3118_s29  ;;  %s3707_s29 = smov %s3216_s14 }
 0x1e4   : > { %s3708_s30 = smov %s3204_s11  ;;  %29 = sbr.rel (!%p27_p6) target bundleno = 12 (0xc), region = 132 }
 0x1e9   :  { %2239 = vsyncpa [#allocation3], 1 }
 0x1ea   :  { %2241 = vsyncpa [#allocation3 + $0x1], 1 }
 0x1eb   :  { %2242 = vsyncpa [#allocation6], 1 }
 0x1ec   :  { %2243 = vsyncpa [#allocation9], 1 }
 0x1ed   :  { %2245 = vsyncpa [#allocation9 + $0x1], 1 }
 0x1ee   :  { %2246 = vsyncpa [#allocation4], 1 }
 0x1ef   :  { %2248 = vsyncpa [#allocation4 + $0x1], 1 }
 0x1f0   :  { %2249 = vsyncpa [#allocation12], 1 }
 0x1f1   :  { %2251 = vsyncpa [#allocation12 + $0x1], 1 }

</bundles_post_ra>
